<compile_context>
chip_gen: v7x
topology: tpu7x:2x2x1
jax: 0.10.0
libtpu: 0.0.40
codegen_flags: <defaults>
</compile_context>

<pallas_src>
import jax
import jax.numpy as jnp
from jax.experimental import pallas as pl
from jax.experimental.pallas import tpu as pltpu


def _make_mlp_kernel(n_hidden):
    """Build a fused-MLP kernel for a fixed (static) number of hidden layers."""

    def kernel(*refs):
        # refs = [x_ref,
        #         (W, b, scale, shift) * n_hidden,
        #         W_out, b_out,
        #         out_ref]
        x_ref = refs[0]
        out_ref = refs[-1]
        params = refs[1:-1]

        h = x_ref[...].astype(jnp.float32)                      # (b_tile, d_in)
        for l in range(n_hidden):
            w_ref, b_ref, sc_ref, sh_ref = params[4 * l: 4 * l + 4]
            h = jnp.dot(h, w_ref[...],
                        preferred_element_type=jnp.float32)     # MXU
            # Linear bias + folded eval-mode BatchNorm1d (VPU).
            h = (h + b_ref[...]) * sc_ref[...] + sh_ref[...]
            h = jnp.maximum(h, 0.0)                              # ReLU
            # Dropout: identity in eval mode.
            # TODO(synk): training-mode Dropout / batch-statistics BatchNorm
            #             (would need pltpu.prng_* and a cross-tile reduction).

        w_out_ref, b_out_ref = params[4 * n_hidden: 4 * n_hidden + 2]
        y = jnp.dot(h, w_out_ref[...],
                    preferred_element_type=jnp.float32) + b_out_ref[...]
        out_ref[...] = y.astype(out_ref.dtype)

    return kernel


def mlp_forward(x, hidden_params, out_params, *, b_tile=64):
    """Fused MLP forward.

    x:             (B, d_in) float32
    hidden_params: list of (W (d_prev, d), b (d,), scale (d,), shift (d,))
    out_params:    (W_out (d_last, d_out), b_out (d_out,))
    returns        (B, d_out) float32
    """
    B, d_in = x.shape
    n_hidden = len(hidden_params)
    W_out, b_out = out_params
    d_out = W_out.shape[1]

    b_tile = min(b_tile, B)
    assert B % b_tile == 0, "batch must be divisible by the batch tile"
    assert b_tile % 8 == 0, "batch tile must be a multiple of 8 (sublane)"

    def const_spec(shape):
        # Grid-invariant parameter block (full array, constant index map).
        return pl.BlockSpec(shape, lambda i: (0, 0))

    in_specs = [pl.BlockSpec((b_tile, d_in), lambda i: (i, 0))]   # x batch tile
    flat_params = []
    for (W, b, sc, sh) in hidden_params:
        d_prev, d = W.shape
        in_specs += [
            const_spec((d_prev, d)),   # W
            const_spec((1, d)),        # bias
            const_spec((1, d)),        # folded BN scale
            const_spec((1, d)),        # folded BN shift
        ]
        flat_params += [W, b.reshape(1, d), sc.reshape(1, d), sh.reshape(1, d)]
    in_specs += [const_spec(W_out.shape), const_spec((1, d_out))]
    flat_params += [W_out, b_out.reshape(1, d_out)]

    grid = (B // b_tile,)

    return pl.pallas_call(
        _make_mlp_kernel(n_hidden),
        out_shape=jax.ShapeDtypeStruct((B, d_out), jnp.float32),
        grid_spec=pltpu.PrefetchScalarGridSpec(
            num_scalar_prefetch=0,
            grid=grid,
            in_specs=in_specs,
            out_specs=pl.BlockSpec((b_tile, d_out), lambda i: (i, 0)),
        ),
        compiler_params=pltpu.CompilerParams(
            dimension_semantics=("parallel",),   # batch tiles are independent
            vmem_limit_bytes=64 * 1024 * 1024,
        ),
    )(x.astype(jnp.float32), *flat_params)


if __name__ == "__main__":
    # Module config (as in MultiLayerPerceptron.__init__), small shapes.
    d_in = 32
    d_layers = [64, 32]
    dropout = 0.1          # eval-mode forward -> identity (see TODO in kernel)
    d_out = 1
    B = 128
    eps = 1e-5             # BatchNorm1d default eps

    key = jax.random.PRNGKey(0)

    def xavier(k, fan_in, fan_out):
        bound = (6.0 / (fan_in + fan_out)) ** 0.5
        return jax.random.uniform(k, (fan_in, fan_out), jnp.float32, -bound, bound)

    # Hidden layers: Linear weights/bias + BatchNorm running stats folded into
    # per-feature (scale, shift).
    hidden_params = []
    d_prev = d_in
    for li, d in enumerate(d_layers):
        kw, kb, kg, kbe, km, kv = jax.random.split(jax.random.fold_in(key, li), 6)
        W = xavier(kw, d_prev, d)
        b = jax.random.uniform(kb, (d,), jnp.float32, -0.1, 0.1)
        gamma = 1.0 + 0.1 * jax.random.normal(kg, (d,), jnp.float32)
        beta = 0.1 * jax.random.normal(kbe, (d,), jnp.float32)
        running_mean = 0.1 * jax.random.normal(km, (d,), jnp.float32)
        running_var = 1.0 + 0.1 * jnp.abs(jax.random.normal(kv, (d,), jnp.float32))
        scale = gamma / jnp.sqrt(running_var + eps)
        shift = beta - running_mean * scale
        hidden_params.append((W, b, scale, shift))
        d_prev = d

    ko_w, ko_b, kx = jax.random.split(jax.random.fold_in(key, 1000), 3)
    W_out = xavier(ko_w, d_prev, d_out)
    b_out = jax.random.uniform(ko_b, (d_out,), jnp.float32, -0.1, 0.1)

    x = jax.random.normal(kx, (B, d_in), jnp.float32)

    out = mlp_forward(x, hidden_params, (W_out, b_out), b_tile=64)
    out = jax.block_until_ready(out)

    # Reference (plain JAX, same eval-mode semantics with folded BN).
    h = x
    for (W, b, sc, sh) in hidden_params:
        h = jnp.maximum(
            (jnp.dot(h, W, precision=jax.lax.Precision.HIGHEST) + b) * sc + sh, 0.0)
    expected = jnp.dot(h, W_out, precision=jax.lax.Precision.HIGHEST) + b_out

    assert out.shape == (B, d_out)
    assert jnp.allclose(out, expected, atol=2e-2, rtol=2e-2), "mismatch vs reference MLP"

    print("KERNEL_OK")
</pallas_src>

<mosaic_0001>
module attributes {stable_mosaic.version = 11 : i64} {
  func.func @kernel(%arg0: i32, %arg1: memref<64x32xf32, #tpu.memory_space<vmem>>, %arg2: memref<32x64xf32, #tpu.memory_space<vmem>>, %arg3: memref<1x64xf32, #tpu.memory_space<vmem>>, %arg4: memref<1x64xf32, #tpu.memory_space<vmem>>, %arg5: memref<1x64xf32, #tpu.memory_space<vmem>>, %arg6: memref<64x32xf32, #tpu.memory_space<vmem>>, %arg7: memref<1x32xf32, #tpu.memory_space<vmem>>, %arg8: memref<1x32xf32, #tpu.memory_space<vmem>>, %arg9: memref<1x32xf32, #tpu.memory_space<vmem>>, %arg10: memref<32x1xf32, #tpu.memory_space<vmem>>, %arg11: memref<1x1xf32, #tpu.memory_space<vmem>>, %arg12: memref<64x1xf32, #tpu.memory_space<vmem>>) attributes {dimension_semantics = [#tpu.dimension_semantics<parallel>], iteration_bounds = array<i64: 2>, scalar_prefetch = 0 : i64, scratch_operands = 0 : i64, tpu.core_type = #tpu.core_type<tc>, window_params = [{transform_indices = @transform_0, window_bounds = array<i64: 64, 32>}, {pipeline_mode = #tpu.pipeline_mode<synchronous>, transform_indices = @transform_1, window_bounds = array<i64: 32, 64>}, {pipeline_mode = #tpu.pipeline_mode<synchronous>, transform_indices = @transform_2, window_bounds = array<i64: 1, 64>}, {pipeline_mode = #tpu.pipeline_mode<synchronous>, transform_indices = @transform_3, window_bounds = array<i64: 1, 64>}, {pipeline_mode = #tpu.pipeline_mode<synchronous>, transform_indices = @transform_4, window_bounds = array<i64: 1, 64>}, {pipeline_mode = #tpu.pipeline_mode<synchronous>, transform_indices = @transform_5, window_bounds = array<i64: 64, 32>}, {pipeline_mode = #tpu.pipeline_mode<synchronous>, transform_indices = @transform_6, window_bounds = array<i64: 1, 32>}, {pipeline_mode = #tpu.pipeline_mode<synchronous>, transform_indices = @transform_7, window_bounds = array<i64: 1, 32>}, {pipeline_mode = #tpu.pipeline_mode<synchronous>, transform_indices = @transform_8, window_bounds = array<i64: 1, 32>}, {pipeline_mode = #tpu.pipeline_mode<synchronous>, transform_indices = @transform_9, window_bounds = array<i64: 32, 1>}, {pipeline_mode = #tpu.pipeline_mode<synchronous>, transform_indices = @transform_10, window_bounds = array<i64: 1, 1>}, {transform_indices = @transform_11, window_bounds = array<i64: 64, 1>}]} {
    %c0 = arith.constant 0 : index
    %c0_0 = arith.constant 0 : index
    %0 = vector.load %arg1[%c0, %c0_0] : memref<64x32xf32, #tpu.memory_space<vmem>>, vector<64x32xf32>
    %c0_1 = arith.constant 0 : index
    %c0_2 = arith.constant 0 : index
    %1 = vector.load %arg2[%c0_1, %c0_2] : memref<32x64xf32, #tpu.memory_space<vmem>>, vector<32x64xf32>
    %cst = arith.constant dense<0.000000e+00> : vector<64x64xf32>
    %2 = tpu.matmul %0, %1, %cst {dimension_numbers = #tpu.dot_dimension_numbers<[1], [0], [0], [1], [0, 0, 1, 1], [], []>} : vector<64x32xf32>, vector<32x64xf32>, vector<64x64xf32> -> vector<64x64xf32>
    %c0_3 = arith.constant 0 : index
    %c0_4 = arith.constant 0 : index
    %3 = vector.load %arg3[%c0_3, %c0_4] : memref<1x64xf32, #tpu.memory_space<vmem>>, vector<1x64xf32>
    %4 = vector.broadcast %3 : vector<1x64xf32> to vector<64x64xf32>
    %5 = arith.addf %2, %4 : vector<64x64xf32>
    %c0_5 = arith.constant 0 : index
    %c0_6 = arith.constant 0 : index
    %6 = vector.load %arg4[%c0_5, %c0_6] : memref<1x64xf32, #tpu.memory_space<vmem>>, vector<1x64xf32>
    %7 = vector.broadcast %6 : vector<1x64xf32> to vector<64x64xf32>
    %8 = arith.mulf %5, %7 : vector<64x64xf32>
    %c0_7 = arith.constant 0 : index
    %c0_8 = arith.constant 0 : index
    %9 = vector.load %arg5[%c0_7, %c0_8] : memref<1x64xf32, #tpu.memory_space<vmem>>, vector<1x64xf32>
    %10 = vector.broadcast %9 : vector<1x64xf32> to vector<64x64xf32>
    %11 = arith.addf %8, %10 : vector<64x64xf32>
    %cst_9 = arith.constant 0.000000e+00 : f32
    %12 = vector.broadcast %cst_9 : f32 to vector<64x64xf32>
    %13 = arith.maximumf %11, %12 : vector<64x64xf32>
    %c0_10 = arith.constant 0 : index
    %c0_11 = arith.constant 0 : index
    %14 = vector.load %arg6[%c0_10, %c0_11] : memref<64x32xf32, #tpu.memory_space<vmem>>, vector<64x32xf32>
    %cst_12 = arith.constant dense<0.000000e+00> : vector<64x32xf32>
    %15 = tpu.matmul %13, %14, %cst_12 {dimension_numbers = #tpu.dot_dimension_numbers<[1], [0], [0], [1], [0, 0, 1, 1], [], []>} : vector<64x64xf32>, vector<64x32xf32>, vector<64x32xf32> -> vector<64x32xf32>
    %c0_13 = arith.constant 0 : index
    %c0_14 = arith.constant 0 : index
    %16 = vector.load %arg7[%c0_13, %c0_14] : memref<1x32xf32, #tpu.memory_space<vmem>>, vector<1x32xf32>
    %17 = vector.broadcast %16 : vector<1x32xf32> to vector<64x32xf32>
    %18 = arith.addf %15, %17 : vector<64x32xf32>
    %c0_15 = arith.constant 0 : index
    %c0_16 = arith.constant 0 : index
    %19 = vector.load %arg8[%c0_15, %c0_16] : memref<1x32xf32, #tpu.memory_space<vmem>>, vector<1x32xf32>
    %20 = vector.broadcast %19 : vector<1x32xf32> to vector<64x32xf32>
    %21 = arith.mulf %18, %20 : vector<64x32xf32>
    %c0_17 = arith.constant 0 : index
    %c0_18 = arith.constant 0 : index
    %22 = vector.load %arg9[%c0_17, %c0_18] : memref<1x32xf32, #tpu.memory_space<vmem>>, vector<1x32xf32>
    %23 = vector.broadcast %22 : vector<1x32xf32> to vector<64x32xf32>
    %24 = arith.addf %21, %23 : vector<64x32xf32>
    %cst_19 = arith.constant 0.000000e+00 : f32
    %25 = vector.broadcast %cst_19 : f32 to vector<64x32xf32>
    %26 = arith.maximumf %24, %25 : vector<64x32xf32>
    %c0_20 = arith.constant 0 : index
    %c0_21 = arith.constant 0 : index
    %27 = vector.load %arg10[%c0_20, %c0_21] : memref<32x1xf32, #tpu.memory_space<vmem>>, vector<32x1xf32>
    %cst_22 = arith.constant dense<0.000000e+00> : vector<64x1xf32>
    %28 = tpu.matmul %26, %27, %cst_22 {dimension_numbers = #tpu.dot_dimension_numbers<[1], [0], [0], [1], [0, 0, 1, 1], [], []>} : vector<64x32xf32>, vector<32x1xf32>, vector<64x1xf32> -> vector<64x1xf32>
    %c0_23 = arith.constant 0 : index
    %c0_24 = arith.constant 0 : index
    %29 = vector.load %arg11[%c0_23, %c0_24] : memref<1x1xf32, #tpu.memory_space<vmem>>, vector<1x1xf32>
    %30 = vector.broadcast %29 : vector<1x1xf32> to vector<64x1xf32>
    %31 = arith.addf %28, %30 : vector<64x1xf32>
    %c0_25 = arith.constant 0 : index
    %c0_26 = arith.constant 0 : index
    %32 = vector.load %arg12[%c0_25, %c0_26] : memref<64x1xf32, #tpu.memory_space<vmem>>, vector<64x1xf32>
    tpu.vector_store %arg12[%c0_25, %c0_26], %31 {strides = array<i32>} : memref<64x1xf32, #tpu.memory_space<vmem>>, vector<64x1xf32>,
    return
  }
  func.func @transform_0(%arg0: i32) -> (i32, i32) {
    %c0_i32 = arith.constant 0 : i32
    %c0_i32_0 = arith.constant 0 : i32
    return %arg0, %c0_i32 : i32, i32
  }
  func.func @transform_1(%arg0: i32) -> (i32, i32) {
    %c0_i32 = arith.constant 0 : i32
    %c0_i32_0 = arith.constant 0 : i32
    %c0_i32_1 = arith.constant 0 : i32
    return %c0_i32, %c0_i32_0 : i32, i32
  }
  func.func @transform_2(%arg0: i32) -> (i32, i32) {
    %c0_i32 = arith.constant 0 : i32
    %c0_i32_0 = arith.constant 0 : i32
    %c0_i32_1 = arith.constant 0 : i32
    return %c0_i32, %c0_i32_0 : i32, i32
  }
  func.func @transform_3(%arg0: i32) -> (i32, i32) {
    %c0_i32 = arith.constant 0 : i32
    %c0_i32_0 = arith.constant 0 : i32
    %c0_i32_1 = arith.constant 0 : i32
    return %c0_i32, %c0_i32_0 : i32, i32
  }
  func.func @transform_4(%arg0: i32) -> (i32, i32) {
    %c0_i32 = arith.constant 0 : i32
    %c0_i32_0 = arith.constant 0 : i32
    %c0_i32_1 = arith.constant 0 : i32
    return %c0_i32, %c0_i32_0 : i32, i32
  }
  func.func @transform_5(%arg0: i32) -> (i32, i32) {
    %c0_i32 = arith.constant 0 : i32
    %c0_i32_0 = arith.constant 0 : i32
    %c0_i32_1 = arith.constant 0 : i32
    return %c0_i32, %c0_i32_0 : i32, i32
  }
  func.func @transform_6(%arg0: i32) -> (i32, i32) {
    %c0_i32 = arith.constant 0 : i32
    %c0_i32_0 = arith.constant 0 : i32
    %c0_i32_1 = arith.constant 0 : i32
    return %c0_i32, %c0_i32_0 : i32, i32
  }
  func.func @transform_7(%arg0: i32) -> (i32, i32) {
    %c0_i32 = arith.constant 0 : i32
    %c0_i32_0 = arith.constant 0 : i32
    %c0_i32_1 = arith.constant 0 : i32
    return %c0_i32, %c0_i32_0 : i32, i32
  }
  func.func @transform_8(%arg0: i32) -> (i32, i32) {
    %c0_i32 = arith.constant 0 : i32
    %c0_i32_0 = arith.constant 0 : i32
    %c0_i32_1 = arith.constant 0 : i32
    return %c0_i32, %c0_i32_0 : i32, i32
  }
  func.func @transform_9(%arg0: i32) -> (i32, i32) {
    %c0_i32 = arith.constant 0 : i32
    %c0_i32_0 = arith.constant 0 : i32
    %c0_i32_1 = arith.constant 0 : i32
    return %c0_i32, %c0_i32_0 : i32, i32
  }
  func.func @transform_10(%arg0: i32) -> (i32, i32) {
    %c0_i32 = arith.constant 0 : i32
    %c0_i32_0 = arith.constant 0 : i32
    %c0_i32_1 = arith.constant 0 : i32
    return %c0_i32, %c0_i32_0 : i32, i32
  }
  func.func @transform_11(%arg0: i32) -> (i32, i32) {
    %c0_i32 = arith.constant 0 : i32
    %c0_i32_0 = arith.constant 0 : i32
    return %arg0, %c0_i32 : i32, i32
  }
}

</mosaic_0001>

<bundles_post_ra>
// kernel: tpu_custom_call.1
= control target key start
LH: loop header
LB: loop body
LE: loop exit
PB: predicated region body
PF: predicated region fallthrough
CT: control target
= control target key end

     0   :  { %s2458_s0 = inlined_call_operand.hbm [shape: f32[128,32], index: 0, kind: input, shape index: {}]   ;;  %s2459_s1 = inlined_call_operand.hbm [shape: f32[32,64], index: 1, kind: input, shape index: {}]   ;;  %s2460_s2 = inlined_call_operand.hbm [shape: f32[1,64], index: 2, kind: input, shape index: {}]   ;;  %s2461_s3 = inlined_call_operand.hbm [shape: f32[1,64], index: 3, kind: input, shape index: {}]   ;;  %s2462_s4 = inlined_call_operand.hbm [shape: f32[1,64], index: 4, kind: input, shape index: {}]   ;;  %s2463_s5 = inlined_call_operand.hbm [shape: f32[64,32], index: 5, kind: input, shape index: {}]   ;;  %s2464_s6 = inlined_call_operand.hbm [shape: f32[1,32], index: 6, kind: input, shape index: {}]   ;;  %s2465_s7 = inlined_call_operand.hbm [shape: f32[1,32], index: 7, kind: input, shape index: {}]   ;;  %s2466_s8 = inlined_call_operand.hbm [shape: f32[1,32], index: 8, kind: input, shape index: {}]   ;;  %s2467_s9 = inlined_call_operand.hbm [shape: f32[32,1], index: 9, kind: input, shape index: {}]   ;;  %s2468_s10 = inlined_call_operand.<no memory space> [shape: f32[1,1], index: 10, kind: input, shape index: {}]   ;;  %s2469_s11 = inlined_call_operand.hbm [shape: f32[128,1], index: 11, kind: output, shape index: {}]  }
   0x1   :  { %2476 = sst [smem:[#allocation29_spill]] %s2459_s1  ;;  %v16_v0 = vstv %s2468_s10 }
   0x2   :  { %2477 = sst [smem:[#allocation30_spill]] %s2469_s11  ;;  %17 = vst [vmem:[#allocation2] sm:$0x1] %v16_v0 }
   0x3   :  { %18 = vsyncpa [#allocation4], 0 }
   0x4   :  { %20 = vsyncpa [#allocation4 + $0x1], 0 }
   0x5   :  { %21 = vsyncpa [#allocation7], 0 }
   0x6   :  { %22 = vsyncpa [#allocation10], 0 }
   0x7   :  { %23 = vsyncpa [#allocation13], 0 }
   0x8   :  { %24 = vsyncpa [#allocation16], 0 }
   0x9   :  { %25 = vsyncpa [#allocation19], 0 }
   0xa   :  { %26 = vsyncpa [#allocation5], 0 }
   0xb   :  { %28 = vsyncpa [#allocation5 + $0x1], 0  ;;  %s2018_s19 = smov 0   ;;  %s2020_s20 = smov 0  }
   0xc   :  { %s2022_s21 = smov 0   ;;  %s2024_s22 = smov 0  }
   0xd LB: > { %s1940_s10 = smov [#allocation6]   ;;  %s2039_s24 = sadd.s32 4294967295, %s1938_s22   ;;  %s1938_s22 = sphi %s2024_s22, %s2508_s22   ;;  %s1934_s21 = sphi %s2022_s21, %s2507_s21   ;;  %s1930_s20 = sphi %s2020_s20, %s2506_s20   ;;  %s1926_s19 = sphi %s2018_s19, %s2505_s19  }
   0xe   : > { %s313_s23 = sshll.u32 %s1940_s10, 4  ;;  %p1221_p0 = scmp.ge.s32.totalorder %s1938_s22, 1  ;;  %s2044_s23 = int_to_ptr.vmem [resolvable:$true] %s313_s23 }
   0xf   : > { %p2472_p1 = scmp.eq.s32.totalorder %s2039_s24, 0  ;;  %p301_p2 = scmp.lt.s32.totalorder %s1938_s22, 3 }
  0x10   : > { %s1941_s26 = smov [#allocation9]   ;;  %s1942_s29 = smov [#allocation12]  }
  0x11   : > { %p2046_p3 = pnand %p1221_p0, %p301_p2  ;;  %s338_s27 = sshll.u32 %s1941_s26, 4  ;;  %s2059_s27 = int_to_ptr.vmem [resolvable:$true] %s338_s27 }
  0x12   : > { %s359_s30 = sshll.u32 %s1942_s29, 4  ;;  %s2481_s1 = sld [smem:[#allocation29_spill]]  ;;  %s2061_s30 = int_to_ptr.vmem [resolvable:$true] %s359_s30 }
  0x13   : > { %s2478_s25 = scalar_select %p2046_p3, 1, 0 }
  0x14   : > { %p1469_p5 = pneg %p2046_p3 }
  0x15   : > { %2479 = sst [smem:[#allocation28_spill]] %s2478_s25 }
  0x16   : > { %p2055_p6 = pnand %p1469_p5, %p2472_p1 }
  0x18   : > { %s1570_s14 = scalar_lea.hbm %s2481_s1, 512  ;;  %p2071_p8 = pneg %p2055_p6 }
  0x19   : > { %p1571_p7 = scmp.ne.s32.totalorder %s2481_s1, %s1570_s14  ;;  %p1577_p11 = scmp.lt.u32.totalorder %s1570_s14, %s2481_s1 }
  0x1b   : > { %p1573_p9 = pnand %p2071_p8, %p1571_p7 }
  0x1d   : > { %p1574_p10 = pneg %p1573_p9 }
  0x1f   : > { %p1579_p12 = pnand %p1577_p11, %p1574_p10 }
  0x21   : > { %1582 = shalt.err (!%p1579_p12)
}
  0x22   : > { %s1583_s26 = scalar_lea.vmem %s2044_s23, 512  ;;  %p1591_p5 = scmp.lt.s32.totalorder %s2044_s23, %s2044_s23 }
  0x23   : > { %p1584_p13 = scmp.ne.s32.totalorder %s2044_s23, %s1583_s26  ;;  %p1592_p4 = scmp.lt.s32.totalorder %s1583_s26, %s1583_s26 }
  0x25   : > { %p1586_p0 = pnand %p1584_p13, %p2071_p8  ;;  %p1593_p7 = por %p1592_p4, %p1591_p5 }
  0x27   : > { %p1587_p2 = pneg %p1586_p0 }
  0x29   : > { %p1594_p9 = pnand %p1593_p7, %p1587_p2 }
  0x2b   : > { %1597 = shalt.err (!%p1594_p9)
}
  0x2c   : > { %s2474_s29 = smov 128   ;;  %s1944_s12 = smov 8  }
  0x2d   : > { %1472 = dma.hbm_to_vmem [thread:$0]  (!%p2055_p6), %s2481_s1, 512, %s2044_s23, [#allocation7], %s2474_s29, %s2474_s29, %s1944_s12  }
  0x2e   : > { %s1598_s18 = scalar_lea.hbm %s2461_s3, 16 }
  0x2f   : > { %p1599_p4 = scmp.ne.s32.totalorder %s2461_s3, %s1598_s18  ;;  %p1605_p12 = scmp.lt.u32.totalorder %s1598_s18, %s2461_s3 }
  0x31   : > { %p1601_p10 = pnand %p1599_p4, %p2071_p8 }
  0x33   : > { %p1602_p11 = pneg %p1601_p10 }
  0x35   : > { %p1607_p13 = pnand %p1605_p12, %p1602_p11 }
  0x37   : > { %1610 = shalt.err (!%p1607_p13)
}
  0x38   : > { %s1611_s23 = scalar_lea.vmem %s2059_s27, 16  ;;  %s1618_s13 = scalar_lea.vmem %s2059_s27, 32 }
  0x39   : > { %p1612_p0 = scmp.ne.s32.totalorder %s2059_s27, %s1611_s23  ;;  %p1619_p7 = scmp.lt.s32.totalorder %s2059_s27, %s2059_s27 }
  0x3a   : > { %p1620_p9 = scmp.lt.s32.totalorder %s1618_s13, %s1611_s23 }
  0x3b   : > { %p1614_p2 = pnand %p1612_p0, %p2071_p8 }
  0x3c   : > { %p1621_p4 = por %p1620_p9, %p1619_p7 }
  0x3d   : > { %p1615_p5 = pneg %p1614_p2 }
  0x3f   : > { %p1622_p10 = pnand %p1621_p4, %p1615_p5 }
  0x41   : > { %1625 = shalt.err (!%p1622_p10)
}
  0x42   : > { %1478 = dma.hbm_to_vmem [thread:$0]  (!%p2055_p6), %s2461_s3, 16, %s2059_s27, [#allocation10]  }
  0x43   : > { %s1626_s16 = scalar_lea.hbm %s2463_s5, 1024 }
  0x44   : > { %p1627_p11 = scmp.ne.s32.totalorder %s2463_s5, %s1626_s16  ;;  %p1633_p0 = scmp.lt.u32.totalorder %s1626_s16, %s2463_s5 }
  0x46   : > { %p1629_p12 = pnand %p1627_p11, %p2071_p8 }
  0x48   : > { %p1630_p13 = pneg %p1629_p12 }
  0x4a   : > { %p1635_p2 = pnand %p1633_p0, %p1630_p13 }
  0x4c   : > { %1638 = shalt.err (!%p1635_p2)
}
  0x4d   : > { %s1639_s27 = scalar_lea.vmem %s2061_s30, 1024  ;;  %p1647_p4 = scmp.lt.s32.totalorder %s2061_s30, %s2061_s30 }
  0x4e   : > { %p1640_p5 = scmp.ne.s32.totalorder %s2061_s30, %s1639_s27  ;;  %p1648_p10 = scmp.lt.s32.totalorder %s1639_s27, %s1639_s27 }
  0x50   : > { %p1642_p7 = pnand %p1640_p5, %p2071_p8  ;;  %p1649_p11 = por %p1648_p10, %p1647_p4 }
  0x52   : > { %p1643_p9 = pneg %p1642_p7 }
  0x54   : > { %p1650_p12 = pnand %p1649_p11, %p1643_p9 }
  0x56   : > { %1653 = shalt.err (!%p1650_p12)
}
  0x57   : > { %1484 = dma.hbm_to_vmem [thread:$0]  (!%p2055_p6), %s2463_s5, 1024, %s2061_s30, [#allocation13], %s2474_s29, %s2474_s29, %s1944_s12  }
  0x58   : > { %s1945_s25 = smov [#allocation15]   ;;  %s1946_s15 = smov [#allocation8]  }
  0x59   : > { %s384_s14 = sshll.u32 %s1945_s25, 4  ;;  %s327_s16 = sshll.u32 %s1946_s15, 4  ;;  %s385_s14 = int_to_ptr.vmem [resolvable:$true] %s384_s14  ;;  %s328_s16 = int_to_ptr.vmem [resolvable:$true] %s327_s16 }
  0x5a   : > { %s1654_s26 = scalar_lea.hbm %s2465_s7, 16 }
  0x5b   : > { %p1655_p13 = scmp.ne.s32.totalorder %s2465_s7, %s1654_s26  ;;  %p1661_p5 = scmp.lt.u32.totalorder %s1654_s26, %s2465_s7 }
  0x5d   : > { %p1657_p0 = pnand %p1655_p13, %p2071_p8 }
  0x5f   : > { %p1658_p2 = pneg %p1657_p0 }
  0x61   : > { %p1663_p7 = pnand %p1661_p5, %p1658_p2 }
  0x63   : > { %1666 = shalt.err (!%p1663_p7)
}
  0x64   : > { %s1667_s30 = scalar_lea.vmem %s385_s14, 16  ;;  %s1674_s11 = scalar_lea.vmem %s385_s14, 32 }
  0x65   : > { %p1668_p9 = scmp.ne.s32.totalorder %s385_s14, %s1667_s30  ;;  %p1675_p11 = scmp.lt.s32.totalorder %s385_s14, %s385_s14 }
  0x66   : > { %p1676_p12 = scmp.lt.s32.totalorder %s1674_s11, %s1667_s30 }
  0x67   : > { %p1670_p4 = pnand %p1668_p9, %p2071_p8 }
  0x68   : > { %p1677_p1 = por %p1676_p12, %p1675_p11 }
  0x69   : > { %p1671_p10 = pneg %p1670_p4 }
  0x6b   : > { %p1678_p3 = pnand %p1677_p1, %p1671_p10 }
  0x6d   : > { %1681 = shalt.err (!%p1678_p3)
}
  0x6e   : > { %1490 = dma.hbm_to_vmem [thread:$0]  (!%p2055_p6), %s2465_s7, 16, %s385_s14, [#allocation16]  }
  0x6f   : > { %s1682_s10 = scalar_lea.hbm %s2460_s2, 16 }
  0x70   : > { %p1683_p13 = scmp.ne.s32.totalorder %s2460_s2, %s1682_s10  ;;  %p1689_p3 = scmp.lt.u32.totalorder %s1682_s10, %s2460_s2 }
  0x72   : > { %p1685_p0 = pnand %p1683_p13, %p2071_p8 }
  0x74   : > { %p1686_p1 = pneg %p1685_p0 }
  0x76   : > { %p1691_p2 = pnand %p1689_p3, %p1686_p1 }
  0x78   : > { %1694 = shalt.err (!%p1691_p2)
}
  0x79   : > { %s1695_s30 = scalar_lea.vmem %s328_s16, 16  ;;  %s1702_s14 = scalar_lea.vmem %s328_s16, 32 }
  0x7a   : > { %p1696_p5 = scmp.ne.s32.totalorder %s328_s16, %s1695_s30  ;;  %p1703_p4 = scmp.lt.s32.totalorder %s328_s16, %s328_s16 }
  0x7b   : > { %p1704_p10 = scmp.lt.s32.totalorder %s1702_s14, %s1695_s30 }
  0x7c   : > { %p1698_p7 = pnand %p1696_p5, %p2071_p8 }
  0x7d   : > { %p1705_p11 = por %p1704_p10, %p1703_p4 }
  0x7e   : > { %p1699_p9 = pneg %p1698_p7 }
  0x80   : > { %p1706_p12 = pnand %p1705_p11, %p1699_p9 }
  0x82   : > { %1709 = shalt.err (!%p1706_p12)
}
  0x83   : > { %1475 = dma.hbm_to_vmem [thread:$0]  (!%p2055_p6), %s2460_s2, 16, %s328_s16, [#allocation7]  }
  0x84   : > { %s1947_s15 = smov [#allocation11]   ;;  %s1948_s18 = smov [#allocation14]  }
  0x85   : > { %s349_s1 = sshll.u32 %s1947_s15, 4  ;;  %s373_s10 = sshll.u32 %s1948_s18, 4  ;;  %s350_s1 = int_to_ptr.vmem [resolvable:$true] %s349_s1  ;;  %s374_s10 = int_to_ptr.vmem [resolvable:$true] %s373_s10 }
  0x86   : > { %s1710_s27 = scalar_lea.hbm %s2462_s4, 16 }
  0x87   : > { %p1711_p13 = scmp.ne.s32.totalorder %s2462_s4, %s1710_s27  ;;  %p1717_p3 = scmp.lt.u32.totalorder %s1710_s27, %s2462_s4 }
  0x89   : > { %p1713_p0 = pnand %p1711_p13, %p2071_p8 }
  0x8b   : > { %p1714_p1 = pneg %p1713_p0 }
  0x8d   : > { %p1719_p2 = pnand %p1717_p3, %p1714_p1 }
  0x8f   : > { %1722 = shalt.err (!%p1719_p2)
}
  0x90   : > { %s1723_s16 = scalar_lea.vmem %s350_s1, 16  ;;  %s1730_s25 = scalar_lea.vmem %s350_s1, 32 }
  0x91   : > { %p1724_p5 = scmp.ne.s32.totalorder %s350_s1, %s1723_s16  ;;  %p1731_p4 = scmp.lt.s32.totalorder %s350_s1, %s350_s1 }
  0x92   : > { %p1732_p10 = scmp.lt.s32.totalorder %s1730_s25, %s1723_s16 }
  0x93   : > { %p1726_p7 = pnand %p1724_p5, %p2071_p8 }
  0x94   : > { %p1733_p11 = por %p1732_p10, %p1731_p4 }
  0x95   : > { %p1727_p9 = pneg %p1726_p7 }
  0x97   : > { %p1734_p12 = pnand %p1733_p11, %p1727_p9 }
  0x99   : > { %1737 = shalt.err (!%p1734_p12)
}
  0x9a   : > { %1481 = dma.hbm_to_vmem [thread:$0]  (!%p2055_p6), %s2462_s4, 16, %s350_s1, [#allocation10]  }
  0x9b   : > { %s1738_s27 = scalar_lea.hbm %s2464_s6, 16 }
  0x9c   : > { %p1739_p13 = scmp.ne.s32.totalorder %s2464_s6, %s1738_s27  ;;  %p1745_p3 = scmp.lt.u32.totalorder %s1738_s27, %s2464_s6 }
  0x9e   : > { %p1741_p0 = pnand %p1739_p13, %p2071_p8 }
  0xa0   : > { %p1742_p1 = pneg %p1741_p0 }
  0xa2   : > { %p1747_p2 = pnand %p1745_p3, %p1742_p1 }
  0xa4   : > { %1750 = shalt.err (!%p1747_p2)
}
  0xa5   : > { %s1751_s16 = scalar_lea.vmem %s374_s10, 16  ;;  %s1758_s1 = scalar_lea.vmem %s374_s10, 32 }
  0xa6   : > { %p1752_p5 = scmp.ne.s32.totalorder %s374_s10, %s1751_s16  ;;  %p1759_p4 = scmp.lt.s32.totalorder %s374_s10, %s374_s10 }
  0xa7   : > { %p1760_p10 = scmp.lt.s32.totalorder %s1758_s1, %s1751_s16 }
  0xa8   : > { %p1754_p7 = pnand %p1752_p5, %p2071_p8 }
  0xa9   : > { %p1761_p11 = por %p1760_p10, %p1759_p4 }
  0xaa   : > { %p1755_p9 = pneg %p1754_p7 }
  0xac   : > { %p1762_p12 = pnand %p1761_p11, %p1755_p9 }
  0xae   : > { %1765 = shalt.err (!%p1762_p12)
}
  0xaf   : > { %1487 = dma.hbm_to_vmem [thread:$0]  (!%p2055_p6), %s2464_s6, 16, %s374_s10, [#allocation13]  }
  0xb0   : > { %s1949_s18 = smov [#allocation17]   ;;  %s1950_s23 = smov [#allocation18]  }
  0xb1   : > { %s395_s26 = sshll.u32 %s1949_s18, 4  ;;  %s405_s27 = sshll.u32 %s1950_s23, 4  ;;  %s396_s26 = int_to_ptr.vmem [resolvable:$true] %s395_s26  ;;  %s406_s27 = int_to_ptr.vmem [resolvable:$true] %s405_s27 }
  0xb2   : > { %s1766_s14 = scalar_lea.hbm %s2466_s8, 16 }
  0xb3   : > { %p1767_p13 = scmp.ne.s32.totalorder %s2466_s8, %s1766_s14  ;;  %p1773_p3 = scmp.lt.u32.totalorder %s1766_s14, %s2466_s8 }
  0xb5   : > { %p1769_p0 = pnand %p1767_p13, %p2071_p8 }
  0xb7   : > { %p1770_p1 = pneg %p1769_p0 }
  0xb9   : > { %p1775_p2 = pnand %p1773_p3, %p1770_p1 }
  0xbb   : > { %1778 = shalt.err (!%p1775_p2)
}
  0xbc   : > { %s1779_s10 = scalar_lea.vmem %s396_s26, 16  ;;  %s1786_s15 = scalar_lea.vmem %s396_s26, 32 }
  0xbd   : > { %p1780_p5 = scmp.ne.s32.totalorder %s396_s26, %s1779_s10  ;;  %p1787_p4 = scmp.lt.s32.totalorder %s396_s26, %s396_s26 }
  0xbe   : > { %p1788_p10 = scmp.lt.s32.totalorder %s1786_s15, %s1779_s10 }
  0xbf   : > { %p1782_p7 = pnand %p1780_p5, %p2071_p8 }
  0xc0   : > { %p1789_p11 = por %p1788_p10, %p1787_p4 }
  0xc1   : > { %p1783_p9 = pneg %p1782_p7 }
  0xc3   : > { %p1790_p12 = pnand %p1789_p11, %p1783_p9 }
  0xc5   : > { %1793 = shalt.err (!%p1790_p12)
}
  0xc6   : > { %1493 = dma.hbm_to_vmem [thread:$0]  (!%p2055_p6), %s2466_s8, 16, %s396_s26, [#allocation16]  }
  0xc7   : > { %s1794_s14 = scalar_lea.hbm %s2467_s9, 512 }
  0xc8   : > { %p1795_p13 = scmp.ne.s32.totalorder %s2467_s9, %s1794_s14  ;;  %p1801_p3 = scmp.lt.u32.totalorder %s1794_s14, %s2467_s9 }
  0xca   : > { %p1797_p0 = pnand %p1795_p13, %p2071_p8 }
  0xcc   : > { %p1798_p1 = pneg %p1797_p0 }
  0xce   : > { %p1803_p2 = pnand %p1801_p3, %p1798_p1 }
  0xd0   : > { %1806 = shalt.err (!%p1803_p2)
}
  0xd1   : > { %s1807_s10 = scalar_lea.vmem %s406_s27, 512  ;;  %p1815_p4 = scmp.lt.s32.totalorder %s406_s27, %s406_s27 }
  0xd2   : > { %p1808_p5 = scmp.ne.s32.totalorder %s406_s27, %s1807_s10  ;;  %p1816_p10 = scmp.lt.s32.totalorder %s1807_s10, %s1807_s10 }
  0xd4   : > { %p1810_p7 = pnand %p1808_p5, %p2071_p8  ;;  %p1817_p11 = por %p1816_p10, %p1815_p4 }
  0xd6   : > { %p1811_p9 = pneg %p1810_p7 }
  0xd8   : > { %p1818_p12 = pnand %p1817_p11, %p1811_p9 }
  0xda   : > { %1821 = shalt.err (!%p1818_p12)
}
  0xdb   : > { %1496 = dma.hbm_to_vmem [thread:$0]  (!%p2055_p6), %s2467_s9, 512, %s406_s27, [#allocation19], %s2474_s29, %s2474_s29, %s1944_s12  }
  0xdc   : > { %s1220_s28 = sadd.s32 4294967294, %s1938_s22   ;;  %s2258_s17 = sadd.s32 1, %s1938_s22  }
  0xdd   : > { %s41_s18 = sadd.s32 1, %s1934_s21  ;;  %s38_s23 = ssub.s32 %s1938_s22, %s2258_s17 }
  0xde   : > { %p48_p8 = scmp.ne.s32.totalorder %s1934_s21, %s1930_s20  ;;  %p39_p13 = scmp.eq.s32.totalorder %s38_s23, 0 }
  0xdf   : > { %p49_p0 = scmp.eq.s32.totalorder %s1938_s22, 0  ;;  %p54_p1 = scmp.ne.s32.totalorder %s1930_s20, %s1926_s19 }
  0xe0   : > { %p288_p3 = scmp.eq.s32.totalorder %s2039_s24, 1  ;;  %p2483_p5 = scmp.eq.s32.totalorder %s2039_s24, 0 }
  0xe1   : > { %s2270_s13 = scalar_select %p39_p13, %s1934_s21, %s41_s18  }
  0xe2   : > { %p50_p2 = por %p49_p0, %p48_p8  ;;  %p2274_p7 = por %p2483_p5, %p54_p1 }
  0xe3   : > { %p2278_p6 = por %p288_p3, %p48_p8  ;;  %p294_p9 = scmp.eq.s32.totalorder %s1220_s28, 1 }
  0xe4   : > { %p1514_p4 = scmp.lt.s32.totalorder %s1938_s22, 2  ;;  %s422_s14 = sand.u32 1, %s1934_s21  }
  0xe5   : > { %s2485_s27 = scalar_select %p2278_p6, 1, 0 }
  0xe6   : > { %p2284_p10 = por %p294_p9, %p54_p1  ;;  %s1232_s16 = sshll.u32 %s422_s14, 6 }
  0xe7   : > { %s1283_s1 = sshll.u32 %s1938_s22, 10  ;;  %s426_s15 = scalar_lea.vmem [#allocation3], %s1232_s16 }
  0xe8   : > { %s2486_s11 = scalar_select %p2284_p10, 1, 0 }
  0xe9   : > { %s2292_s26 = scalar_lea.hbm %s2458_s0, %s1283_s1  ;;  %s433_s18 = sshll.u32 %s426_s15, 4  ;;  %s2298_s18 = int_to_ptr.vmem [resolvable:$true] %s433_s18 }
  0xea   : > { %p2294_p11 = pnand %p1514_p4, %p50_p2  ;;  %s2300_s23 = scalar_lea.sflag [#allocation4], %s422_s14 }
  0xeb   : > { %s1822_s29 = scalar_lea.hbm %s2292_s26, 1024  ;;  %s1827_s25 = scalar_lea.hbm %s2458_s0, 2048 }
  0xec   : > { %p1823_p12 = scmp.ne.s32.totalorder %s2292_s26, %s1822_s29  ;;  %p1824_p8 = pneg %p2294_p11 }
  0xed   : > { %p1828_p1 = scmp.lt.u32.totalorder %s2292_s26, %s2458_s0  ;;  %p1829_p3 = scmp.lt.u32.totalorder %s1827_s25, %s1822_s29 }
  0xee   : > { %p1825_p13 = pnand %p1824_p8, %p1823_p12  ;;  %p1831_p5 = scmp.lt.u32.totalorder %s1822_s29, %s2292_s26 }
  0xef   : > { %p1830_p2 = por %p1829_p3, %p1828_p1 }
  0xf0   : > { %p1826_p0 = pneg %p1825_p13 }
  0xf1   : > { %p1832_p9 = por %p1831_p5, %p1830_p2 }
  0xf3   : > { %p1833_p4 = pnand %p1832_p9, %p1826_p0 }
  0xf5   : > { %1836 = shalt.err (!%p1833_p4)
}
  0xf6   : > { %s1837_s14 = scalar_lea.vmem %s2298_s18, 1024  ;;  %s1951_s16 = smov [#allocation3]  }
  0xf7   : > { %p1838_p12 = scmp.ne.s32.totalorder %s2298_s18, %s1837_s14  ;;  %s1842_s1 = sshll.u32 %s1951_s16, 4  ;;  %s1843_s1 = int_to_ptr.vmem [resolvable:$false] %s1842_s1 }
  0xf8   : > { %s1844_s10 = scalar_lea.vmem %s1843_s1, 2048  ;;  %p1845_p6 = scmp.lt.s32.totalorder %s2298_s18, %s1843_s1 }
  0xf9   : > { %p1840_p13 = pnand %p1838_p12, %p1824_p8  ;;  %p1846_p1 = scmp.lt.s32.totalorder %s1844_s10, %s1837_s14 }
  0xfb   : > { %p1841_p10 = pneg %p1840_p13  ;;  %p1847_p3 = por %p1846_p1, %p1845_p6 }
  0xfd   : > { %p1848_p2 = pnand %p1847_p3, %p1841_p10 }
  0xff   : > { %1851 = shalt.err (!%p1848_p2)
}
 0x100   : > { %s2488_s29 = smov 128   ;;  %s2489_s25 = sld [smem:[#allocation28_spill]] }
 0x101   : > { %1500 = dma.hbm_to_vmem [thread:$0]  (!%p2294_p11), %s2292_s26, 1024, %s2298_s18, %s2300_s23, %s2488_s29, %s2488_s29, %s1944_s12  }
 0x106   : > { %p2490_p8 = scmp.ne.s32.totalorder %s2489_s25, 0 }
 0x107   : > { %s2334_s15 = sand.u32 (!%p2490_p8), 1, %s1930_s20  }
 0x108   : > { %445 = sbr.rel (%p2490_p8) target bundleno = 985 (0x3d9), region = 64  ;;  %s1236_s14 = sshll.u32 (!%p2490_p8), %s2334_s15, 6 }
 0x109   : > { %s448_s16 = scalar_lea.sflag (!%p2490_p8), [#allocation4], %s2334_s15  ;;  %s2340_s28 = scalar_lea.vmem (!%p2490_p8), [#allocation3], %s1236_s14 }
 0x10f   : > { %1897 = dma.done.wait (%p2274_p7), %s448_s16, 1024  }
 0x110   : > { %1899 = vsyncadd (%p2274_p7), %s448_s16, 4294966272  ;;  %p2491_p6 = scmp.eq.s32.totalorder %s2039_s24, 0 }
 0x112   : > { %1901 = dma.done.wait (%p2491_p6), [#allocation7], 528   ;;  %p2492_p10 = pmov %p2491_p6 }
 0x113   : > { %p2493_p11 = pmov %p2491_p6 }
 0x114   : > { %1903 = vsyncadd (%p2492_p10), [#allocation7], 4294966768 }
 0x115   : > { %1905 = dma.done.wait (%p2493_p11), [#allocation10], 32   ;;  %p2494_p0 = pmov %p2491_p6 }
 0x117   : > { %1907 = vsyncadd (%p2494_p0), [#allocation10], 4294967264  ;;  %p2495_p5 = pmov %p2494_p0 }
 0x118   : > { %p2496_p9 = pmov %p2494_p0 }
 0x119   : > { %1909 = dma.done.wait (%p2495_p5), [#allocation13], 1040  }
 0x11a   : > { %1911 = vsyncadd (%p2496_p9), [#allocation13], 4294966256  ;;  %p2497_p7 = pmov %p2494_p0 }
 0x11b   : > { %p2498_p4 = pmov %p2494_p0 }
 0x11c   : > { %1913 = dma.done.wait (%p2497_p7), [#allocation16], 32  }
 0x11d   : > { %1915 = vsyncadd (%p2498_p4), [#allocation16], 4294967264  ;;  %p2499_p12 = pmov %p2494_p0 }
 0x11e   : > { %p2500_p13 = pmov %p2494_p0 }
 0x11f   : > { %1917 = dma.done.wait (%p2499_p12), [#allocation19], 512  }
 0x120   : > { %1919 = vsyncadd (%p2500_p13), [#allocation19], 4294966784  ;;  %vm547_vm0 = vcmask 261120   ;;  %v536_v1 = vld [vmem:[#allocation6] sm:$0xff]  ;;  %v537_v2 = vld [vmem:[#allocation6 + $0x8] sm:$0xff]  ;;  %vm730_vm1 = vcmask 523264  }
 0x121   : > { %v538_v3 = vld [vmem:[#allocation6 + $0x10] sm:$0xff]  ;;  %v1393_v4 = vpack.c.bf16 %v537_v2, %v536_v1  ;;  %v539_v5 = vld [vmem:[#allocation6 + $0x18] sm:$0xff]  ;;  %v528_v6 = vld [vmem:[%s2340_s28] sm:$0xff]  ;;  %vm1038_vm2 = vcmask 7168   ;;  %s525_s12 = scalar_lea.vmem [#allocation20], %s1236_s14  ;;  %s1284_s30 = sshll.u32 %s2039_s24, 10 }
 0x122   : > { %v1397_v7 = vpack.c.bf16 %v539_v5, %v538_v3  ;;  %1333 = vmatprep.mubr.msk.f32.mxu0 %vm547_vm0, %v528_v6  ;;  %v715_v8 = vld [vmem:[#allocation12] sm:$0xff]  ;;  %v716_v9 = vld [vmem:[#allocation12 + $0x8] sm:$0xff]  ;;  %v717_v10 = vld [vmem:[#allocation12 + $0x10] sm:$0xff]  ;;  %s1061_s26 = sshll.u32 %s525_s12, 4  ;;  %s2501_s1 = sld [smem:[#allocation30_spill]]  ;;  %s2412_s26 = int_to_ptr.vmem [resolvable:$true] %s1061_s26 }
 0x123   : > { %1394 = vmatprep.subr.bf16.mxu0 %v1393_v4  ;;  %v1401_v11 = vpack.c.bf16 %v716_v9, %v715_v8  ;;  %v718_v12 = vld [vmem:[#allocation12 + $0x18] sm:$0xff]  ;;  %v529_v14 = vld [vmem:[%s2340_s28 + $0x8] sm:$0xff]  ;;  %v530_v15 = vld [vmem:[%s2340_s28 + $0x10] sm:$0xff]  ;;  %s1048_s24 = scalar_lea.sflag [#allocation5], %s2334_s15  ;;  %s1852_s29 = scalar_lea.vmem %s2412_s26, 1024 }
 0x124   : > { %1396 = vmatpush3.bf16.msra.mxu0 %v1393_v4  ;;  %v1405_v13 = vpack.c.bf16 %v718_v12, %v717_v10  ;;  %v531_v16 = vld [vmem:[%s2340_s28 + $0x18] sm:$0xff]  ;;  %v532_v17 = vld [vmem:[%s2340_s28 + $0x20] sm:$0xff]  ;;  %v533_v18 = vld [vmem:[%s2340_s28 + $0x28] sm:$0xff]  ;;  %p1853_p1 = scmp.ne.s32.totalorder %s2412_s26, %s1852_s29  ;;  %p2502_p3 = scmp.ne.s32.totalorder %s2485_s27, 0 }
 0x125   : > { %1398 = vmatprep.subr.bf16.mxu0 %v1397_v7  ;;  %1402 = vmatprep.subr.bf16.mxu1 %v1401_v11  ;;  %v534_v19 = vld [vmem:[%s2340_s28 + $0x30] sm:$0xff]  ;;  %v535_v20 = vld [vmem:[%s2340_s28 + $0x38] sm:$0xff]  ;;  %v719_v21 = vld [vmem:[#allocation12 + $0x20] sm:$0xff]  ;;  %s1952_s25 = smov [#allocation20]  }
 0x126   : > { %1404 = vmatpush3.bf16.msra.mxu1 %v1401_v11  ;;  %v720_v22 = vld [vmem:[#allocation12 + $0x28] sm:$0xff]  ;;  %v721_v24 = vld [vmem:[#allocation12 + $0x30] sm:$0xff]  ;;  %v722_v25 = vld [vmem:[#allocation12 + $0x38] sm:$0xff]  ;;  %p1854_p2 = pnand %p1853_p1, %p2502_p3  ;;  %s1856_s14 = sshll.u32 %s1952_s25, 4  ;;  %s1857_s14 = int_to_ptr.vmem [resolvable:$false] %s1856_s14 }
 0x127   : > { %1406 = vmatprep.subr.bf16.mxu1 %v1405_v13  ;;  %v1409_v23 = vpack.c.bf16 %v720_v22, %v719_v21  ;;  %v1413_v26 = vpack.c.bf16 %v722_v25, %v721_v24  ;;  %v898_v27 = vld [vmem:[#allocation18] sm:$0xff]  ;;  %v899_v28 = vld [vmem:[#allocation18 + $0x8] sm:$0xff]  ;;  %v1247_v30 = vld [vmem:[#allocation8] ss:$0 sm:$0xff]  ;;  %s1858_s16 = scalar_lea.vmem %s1857_s14, 2048  ;;  %p1859_p6 = scmp.lt.s32.totalorder %s2412_s26, %s1857_s14 }
 0x128   : > { %1400 = vmatpush3.bf16.msra.mxu0 %v1397_v7  ;;  %v1417_v29 = vpack.c.bf16 %v899_v28, %v898_v27  ;;  %v1256_v32 = vld [vmem:[#allocation9] ss:$0 sm:$0xff]  ;;  %v1257_v35 = vld [vmem:[#allocation11] ss:$0 sm:$0xff]  ;;  %v1258_v12 = vld [vmem:[#allocation14] ss:$0 sm:$0xff]  ;;  %s2410_s10 = scalar_lea.hbm %s2501_s1, %s1284_s30  ;;  %p1855_p8 = pneg %p1854_p2 }
 0x129   : > { %v900_v9 = vld [vmem:[#allocation18 + $0x10] sm:$0xff]  ;;  %v901_v10 = vld [vmem:[#allocation18 + $0x18] sm:$0xff]  ;;  %p1860_p10 = scmp.lt.s32.totalorder %s1858_s16, %s1852_s29 }
 0x12a   : > { %1408 = vmatpush3.bf16.msra.mxu1 %v1405_v13  ;;  %1418 = vmatprep.subr.bf16.mxu0 %v1417_v29  ;;  %v1421_v11 = vpack.c.bf16 %v901_v10, %v900_v9 }
 0x12b   : > { %1334 = vmatmul.mubr.msk.f32.vlgmr.msra.gmra.mrb[0].mxu0 %vm547_vm0, %v529_v14  ;;  %1410 = vmatprep.subr.bf16.mxu1 %v1409_v23  ;;  %v1267_v14 = vld [vmem:[#allocation15] ss:$0 sm:$0xff]  ;;  %p1861_p11 = por %p1860_p10, %p1859_p6 }
 0x12c   : > { %1336 = vmatprep.mubr.msk.f32.mxu0 %vm547_vm0, %v530_v15  ;;  %1420 = vmatpush3.bf16.msra.mxu0 %v1417_v29 }
 0x12d   : > { %1422 = vmatprep.subr.bf16.mxu0 %v1421_v11  ;;  %p1862_p0 = pnand %p1861_p11, %p1855_p8 }
 0x12e   : > { %1412 = vmatpush3.bf16.msra.mxu1 %v1409_v23 }
 0x12f   : > { %1337 = vmatmul.mubr.msk.f32.gmra.mrb[2].mxu0 %vm547_vm0, %v531_v16  ;;  %1414 = vmatprep.subr.bf16.mxu1 %v1413_v26 }
 0x130   : > { %1339 = vmatprep.mubr.msk.f32.mxu0 %vm547_vm0, %v532_v17  ;;  %1424 = vmatpush3.bf16.msra.mxu0 %v1421_v11  ;;  %v1268_v17 = vld [vmem:[#allocation17] ss:$0 sm:$0xff] }
 0x132   : > { %1416 = vmatpush3.bf16.msra.mxu1 %v1413_v26 }
 0x133   : > { %1340 = vmatmul.mubr.msk.f32.gmra.mrb[4].mxu0 %vm547_vm0, %v533_v18  ;;  %1425 = vmatprep.subr.bf16.mxu1 %v1417_v29 }
 0x134   : > { %1342 = vmatprep.mubr.msk.f32.mxu0 %vm547_vm0, %v534_v19 }
 0x137   : > { %1343 = vmatmul.mubr.msk.f32.gmra.mrb[6].mxu0 %vm547_vm0, %v535_v20 }
 0x1fe   : > { %v1335_v31 = vpop.f32.mrb[0].mxu0 }
 0x1ff   : > { %v644_v33 = vadd.f32 %v1335_v31, %v1247_v30  ;;  %v638_v34 = vpop.f32.mrb[1].mxu0 }
 0x200   : > { %v639_v36 = vadd.f32 %v1247_v30, %v638_v34 }
 0x201   : > { %v685_v37 = vmul.f32 %v1256_v32, %v644_v33 }
 0x202   : > { %v684_v38 = vmul.f32 %v1256_v32, %v639_v36  ;;  %v1338_v39 = vpop.f32.mrb[2].mxu0 }
 0x203   : > { %v700_v40 = vadd.f32 %v1257_v35, %v685_v37  ;;  %v654_v41 = vadd.f32 %v1338_v39, %v1247_v30  ;;  %v648_v42 = vpop.f32.mrb[3].mxu0 }
 0x204   : > { %v649_v43 = vadd.f32 %v1247_v30, %v648_v42  ;;  %v699_v44 = vadd.f32 %v1257_v35, %v684_v38 }
 0x205   : > { %v687_v45 = vmul.f32 %v1256_v32, %v654_v41  ;;  %v708_v49 = vmax.f32 %v700_v40, 0.0 }
 0x206   : > { %v686_v46 = vmul.f32 %v1256_v32, %v649_v43  ;;  %v1341_v47 = vpop.f32.mrb[4].mxu0  ;;  %v707_v48 = vmax.f32 %v699_v44, 0.0 }
 0x207   : > { %v702_v50 = vadd.f32 %v1257_v35, %v687_v45  ;;  %v664_v51 = vadd.f32 %v1341_v47, %v1247_v30  ;;  %v658_v52 = vpop.f32.mrb[5].mxu0 }
 0x208   : > { %v701_v53 = vadd.f32 %v1257_v35, %v686_v46  ;;  %v659_v54 = vadd.f32 %v1247_v30, %v658_v52  ;;  %1361 = vmatprep.mubr.msk.f32.mxu1 %vm730_vm1, %v707_v48 }
 0x209   : > { %v689_v55 = vmul.f32 %v1256_v32, %v664_v51  ;;  %1362 = vmatmul.mubr.msk.f32.vlgmr.msra.gmra.mrb[0].mxu1 %vm730_vm1, %v708_v49  ;;  %v710_v59 = vmax.f32 %v702_v50, 0.0 }
 0x20a   : > { %v709_v56 = vmax.f32 %v701_v53, 0.0  ;;  %v688_v57 = vmul.f32 %v1256_v32, %v659_v54  ;;  %v1344_v58 = vpop.f32.mrb[6].mxu0  ;;  %1427 = vmatpush3.bf16.msra.mxu1 %v1417_v29 }
 0x20b   : > { %v704_v60 = vadd.f32 %v1257_v35, %v689_v55  ;;  %v674_v61 = vadd.f32 %v1344_v58, %v1247_v30  ;;  %v668_v62 = vpop.f32.mrb[7].mxu0  ;;  %1426 = vmatprep.subr.bf16.mxu1 %v1421_v11  ;;  %v1269_v55 = vld [vmem:[#allocation2] ss:$0 sm:$0xff] }
 0x20c   : > { %v703_v63 = vadd.f32 %v1257_v35, %v688_v57  ;;  %v669_v0 = vadd.f32 %v1247_v30, %v668_v62  ;;  %1364 = vmatprep.mubr.msk.f32.mxu1 %vm730_vm1, %v709_v56 }
 0x20d   : > { %v691_v1 = vmul.f32 %v1256_v32, %v674_v61  ;;  %1365 = vmatmul.mubr.msk.f32.gmra.mrb[2].mxu1 %vm730_vm1, %v710_v59  ;;  %v712_v4 = vmax.f32 %v704_v60, 0.0 }
 0x20e   : > { %v711_v2 = vmax.f32 %v703_v63, 0.0  ;;  %v690_v3 = vmul.f32 %v1256_v32, %v669_v0  ;;  %1428 = vmatpush3.bf16.msra.mxu1 %v1421_v11 }
 0x20f   : > { %v706_v5 = vadd.f32 %v1257_v35, %v691_v1 }
 0x210   : > { %v705_v6 = vadd.f32 %v1257_v35, %v690_v3  ;;  %1367 = vmatprep.mubr.msk.f32.mxu1 %vm730_vm1, %v711_v2 }
 0x211   : > { %1368 = vmatmul.mubr.msk.f32.gmra.mrb[4].mxu1 %vm730_vm1, %v712_v4  ;;  %v714_v8 = vmax.f32 %v706_v5, 0.0 }
 0x212   : > { %v713_v7 = vmax.f32 %v705_v6, 0.0 }
 0x214   : > { %1370 = vmatprep.mubr.msk.f32.mxu1 %vm730_vm1, %v713_v7 }
 0x215   : > { %1371 = vmatmul.mubr.msk.f32.gmra.mrb[6].mxu1 %vm730_vm1, %v714_v8 }
 0x2dc   : > { %v1363_v13 = vpop.f32.mrb[0].mxu1 }
 0x2dd   : > { %v827_v15 = vadd.f32 %v1363_v13, %v1258_v12  ;;  %v821_v16 = vpop.f32.mrb[1].mxu1 }
 0x2de   : > { %v822_v18 = vadd.f32 %v1258_v12, %v821_v16 }
 0x2df   : > { %v868_v19 = vmul.f32 %v1267_v14, %v827_v15 }
 0x2e0   : > { %v867_v20 = vmul.f32 %v1267_v14, %v822_v18  ;;  %v1366_v21 = vpop.f32.mrb[2].mxu1 }
 0x2e1   : > { %v883_v22 = vadd.f32 %v1268_v17, %v868_v19  ;;  %v837_v23 = vadd.f32 %v1366_v21, %v1258_v12  ;;  %v831_v24 = vpop.f32.mrb[3].mxu1 }
 0x2e2   : > { %v882_v25 = vadd.f32 %v1268_v17, %v867_v20  ;;  %v832_v26 = vadd.f32 %v1258_v12, %v831_v24 }
 0x2e3   : > { %v870_v27 = vmul.f32 %v1267_v14, %v837_v23  ;;  %v891_v31 = vmax.f32 %v883_v22, 0.0 }
 0x2e4   : > { %v890_v28 = vmax.f32 %v882_v25, 0.0  ;;  %v869_v29 = vmul.f32 %v1267_v14, %v832_v26  ;;  %v1369_v30 = vpop.f32.mrb[4].mxu1 }
 0x2e5   : > { %v885_v32 = vadd.f32 %v1268_v17, %v870_v27  ;;  %v847_v33 = vadd.f32 %v1369_v30, %v1258_v12  ;;  %v841_v34 = vpop.f32.mrb[5].mxu1 }
 0x2e6   : > { %v884_v35 = vadd.f32 %v1268_v17, %v869_v29  ;;  %v842_v36 = vadd.f32 %v1258_v12, %v841_v34  ;;  %1381 = vmatprep.mubr.msk.f32.mxu0 %vm547_vm0, %v890_v28 }
 0x2e7   : > { %v872_v37 = vmul.f32 %v1267_v14, %v847_v33  ;;  %1382 = vmatmul.mubr.msk.f32.vlgmr.msra.gmra.mrb[8].mxu0 %vm547_vm0, %v891_v31  ;;  %v893_v41 = vmax.f32 %v885_v32, 0.0 }
 0x2e8   : > { %v892_v38 = vmax.f32 %v884_v35, 0.0  ;;  %v871_v39 = vmul.f32 %v1267_v14, %v842_v36  ;;  %v1372_v40 = vpop.f32.mrb[6].mxu1 }
 0x2e9   : > { %v887_v42 = vadd.f32 %v1268_v17, %v872_v37  ;;  %v857_v43 = vadd.f32 %v1372_v40, %v1258_v12  ;;  %v851_v44 = vpop.f32.mrb[7].mxu1 }
 0x2ea   : > { %v886_v45 = vadd.f32 %v1268_v17, %v871_v39  ;;  %v852_v46 = vadd.f32 %v1258_v12, %v851_v44  ;;  %1384 = vmatprep.mubr.msk.f32.mxu0 %vm547_vm0, %v892_v38 }
 0x2eb   : > { %v874_v47 = vmul.f32 %v1267_v14, %v857_v43  ;;  %1385 = vmatmul.mubr.msk.f32.gmra.mrb[10].mxu0 %vm547_vm0, %v893_v41  ;;  %v895_v50 = vmax.f32 %v887_v42, 0.0 }
 0x2ec   : > { %v894_v48 = vmax.f32 %v886_v45, 0.0  ;;  %v873_v49 = vmul.f32 %v1267_v14, %v852_v46 }
 0x2ed   : > { %v889_v51 = vadd.f32 %v1268_v17, %v874_v47 }
 0x2ee   : > { %v888_v52 = vadd.f32 %v1268_v17, %v873_v49  ;;  %1387 = vmatprep.mubr.msk.f32.mxu0 %vm547_vm0, %v894_v48 }
 0x2ef   : > { %1388 = vmatmul.mubr.msk.f32.gmra.mrb[12].mxu0 %vm547_vm0, %v895_v50  ;;  %v897_v54 = vmax.f32 %v889_v51, 0.0 }
 0x2f0   : > { %v896_v53 = vmax.f32 %v888_v52, 0.0 }
 0x2f2   : > { %1390 = vmatprep.mubr.msk.f32.mxu1 %vm547_vm0, %v896_v53 }
 0x2f3   : > { %1391 = vmatmul.mubr.msk.f32.vlgmr.msra.gmra.mrb[8].mxu1 %vm547_vm0, %v897_v54 }
 0x3ba   : > { %v1383_v56 = vpop.f32.mrb[8].mxu0 }
 0x3bb   : > { %v1005_v57 = vadd.f32 %v1383_v56, %v1269_v55  ;;  %v999_v58 = vpop.f32.mrb[9].mxu0 }
 0x3bc   : > { %v1000_v59 = vadd.f32 %v1269_v55, %v999_v58 }
 0x3bd   : > { %1040 = vst.msk [vmem:[%s525_s12 + $0x8] sm:$0xff] %vm1038_vm2, %v1005_v57 }
 0x3be   : > { %1039 = vst.msk [vmem:[%s525_s12] sm:$0xff] %vm1038_vm2, %v1000_v59  ;;  %v1386_v60 = vpop.f32.mrb[10].mxu0 }
 0x3bf   : > { %v1015_v61 = vadd.f32 %v1386_v60, %v1269_v55  ;;  %v1009_v62 = vpop.f32.mrb[11].mxu0 }
 0x3c0   : > { %v1010_v63 = vadd.f32 %v1269_v55, %v1009_v62 }
 0x3c1   : > { %1042 = vst.msk [vmem:[%s525_s12 + $0x18] sm:$0xff] %vm1038_vm2, %v1015_v61 }
 0x3c2   : > { %1041 = vst.msk [vmem:[%s525_s12 + $0x10] sm:$0xff] %vm1038_vm2, %v1010_v63  ;;  %v1389_v0 = vpop.f32.mrb[12].mxu0 }
 0x3c3   : > { %v1025_v1 = vadd.f32 %v1389_v0, %v1269_v55  ;;  %v1019_v2 = vpop.f32.mrb[13].mxu0 }
 0x3c4   : > { %v1020_v3 = vadd.f32 %v1269_v55, %v1019_v2 }
 0x3c5   : > { %1044 = vst.msk [vmem:[%s525_s12 + $0x28] sm:$0xff] %vm1038_vm2, %v1025_v1 }
 0x3c6   : > { %1043 = vst.msk [vmem:[%s525_s12 + $0x20] sm:$0xff] %vm1038_vm2, %v1020_v3  ;;  %v1392_v4 = vpop.f32.mrb[8].mxu1 }
 0x3c7   : > { %v1035_v5 = vadd.f32 %v1392_v4, %v1269_v55  ;;  %v1029_v6 = vpop.f32.mrb[9].mxu1 }
 0x3c8   : > { %v1030_v7 = vadd.f32 %v1269_v55, %v1029_v6 }
 0x3c9   : > { %1046 = vst.msk [vmem:[%s525_s12 + $0x38] sm:$0xff] %vm1038_vm2, %v1035_v5 }
 0x3ca   : > { %1045 = vst.msk [vmem:[%s525_s12 + $0x30] sm:$0xff] %vm1038_vm2, %v1030_v7 }
 0x3cb   : > { %1865 = shalt.err (!%p1862_p0)
}
 0x3cc   : > { %s1866_s28 = scalar_lea.hbm %s2410_s10, 1024  ;;  %s1870_s18 = scalar_lea.hbm %s2501_s1, 2048 }
 0x3cd   : > { %p1867_p5 = scmp.ne.s32.totalorder %s2410_s10, %s1866_s28  ;;  %p1871_p4 = scmp.lt.u32.totalorder %s2410_s10, %s2501_s1 }
 0x3ce   : > { %p1872_p12 = scmp.lt.u32.totalorder %s1870_s18, %s1866_s28  ;;  %p1874_p1 = scmp.lt.u32.totalorder %s1866_s28, %s2410_s10 }
 0x3cf   : > { %p1868_p9 = pnand %p1867_p5, %p2502_p3 }
 0x3d0   : > { %p1873_p13 = por %p1872_p12, %p1871_p4 }
 0x3d1   : > { %p1869_p7 = pneg %p1868_p9 }
 0x3d2   : > { %p1875_p2 = por %p1874_p1, %p1873_p13 }
 0x3d4   : > { %p1876_p8 = pnand %p1875_p2, %p1869_p7 }
 0x3d6   : > { %1879 = shalt.err (!%p1876_p8)
}
 0x3d7   : > { %s1953_s29 = smov 128   ;;  %s1954_s14 = smov 8  }
 0x3d8   : > { %1467 = dma.vmem_to_hbm [thread:$0]  (%p2502_p3), %s2412_s26, 1024, %s2410_s10, %s1048_s24, %s1953_s29, %s1953_s29, %s1954_s14  }
 0x3d9 PF: > { %s1076_s16 = sand.u32 1, %s1926_s19   ;;  %p2503_p6 = scmp.ne.s32.totalorder %s2486_s11, 0 }
 0x3da   : > { %p2504_p10 = scmp.ge.s32.totalorder %s1938_s22, 2  ;;  %s1077_s28 = scalar_lea.sflag [#allocation5], %s1076_s16 }
 0x3dc   : > { %p1502_p11 = pnand %p2504_p10, %p2503_p6 }
 0x3de   : > { %1921 = dma.done.wait (!%p1502_p11), %s1077_s28, 1024  }
 0x3df   : > { %1923 = vsyncadd (!%p1502_p11), %s1077_s28, 4294966272  ;;  %p31_p0 = scmp.ge.s32.totalorder %s2258_s17, 4   ;;  %s2505_s19 = smov %s1930_s20 }
 0x3e0   : > { %s2506_s20 = smov %s1934_s21  ;;  %s2507_s21 = smov %s2270_s13 }
 0x3e1   : > { %s2508_s22 = smov %s2258_s17  ;;  %33 = sbr.rel (!%p31_p0) target bundleno = 13 (0xd), region = 145 }
 0x3e8   :  { %1082 = vsyncpa [#allocation4], 1 }
 0x3e9   :  { %1084 = vsyncpa [#allocation4 + $0x1], 1 }
 0x3ea   :  { %1085 = vsyncpa [#allocation7], 1 }
 0x3eb   :  { %1086 = vsyncpa [#allocation10], 1 }
 0x3ec   :  { %1087 = vsyncpa [#allocation13], 1 }
 0x3ed   :  { %1088 = vsyncpa [#allocation16], 1 }
 0x3ee   :  { %1089 = vsyncpa [#allocation19], 1 }
 0x3ef   :  { %1090 = vsyncpa [#allocation5], 1 }
 0x3f0   :  { %1092 = vsyncpa [#allocation5 + $0x1], 1 }

</bundles_post_ra>
